<compile_context>
chip_gen: v7x
topology: tpu7x:2x2x1
jax: 0.10.0
libtpu: 0.0.40
codegen_flags: <defaults>
</compile_context>

<pallas_src>
import jax
import jax.numpy as jnp
from jax.experimental import pallas as pl
from jax.experimental.pallas import tpu as pltpu


def _round_up(x, m):
    return ((x + m - 1) // m) * m


def _make_conv_kernel(kh, kw, stride, block_oh, ow, cin_p, cout_p):
    """Fused conv-taps + bias + ReLU kernel for one (batch, row-tile) grid point."""

    def kernel(x_ref, w_ref, b_ref, o_ref):
        # x_ref: (1, Hp, Wp, cin_p)        full padded NHWC image (resident across t)
        # w_ref: (kh*kw, cin_p, cout_p)    weight taps (resident)
        # b_ref: (1, cout_p)
        # o_ref: (1, block_oh, ow, cout_p) lane-dense output tile
        t = pl.program_id(1)
        r0 = pl.multiple_of(t * (block_oh * stride), block_oh * stride)

        acc = jnp.zeros((block_oh * ow, cout_p), jnp.float32)
        for i in range(kh):
            for j in range(kw):
                if stride == 1:
                    xs = x_ref[0, pl.ds(r0 + i, block_oh), pl.ds(j, ow), :]
                else:
                    xs = x_ref[0, pl.ds(r0 + i, block_oh, stride),
                               pl.ds(j, ow, stride), :]
                # (block_oh, ow, cin_p) -> (block_oh*ow, cin_p): lane dim unchanged.
                acc = acc + jnp.dot(xs.reshape(block_oh * ow, cin_p),
                                    w_ref[i * kw + j],
                                    preferred_element_type=jnp.float32)

        acc = jnp.maximum(acc + b_ref[...], 0.0)          # bias + ReLU epilogue
        o_ref[0] = acc.reshape(block_oh, ow, cout_p).astype(o_ref.dtype)

    return kernel


def conv_block_forward(x, weight, bias, *, stride=1, padding=0, block_oh=None):
    """ConvBlock forward: relu(conv2d(x, weight, bias)).

    x:      [N, Cin, H, W]   float32 (NCHW, PyTorch convention)
    weight: [Cout, Cin, KH, KW]
    bias:   [Cout]
    returns [N, Cout, OH, OW]
    """
    n, cin, h, w = x.shape
    cout, _, kh, kw = weight.shape
    oh = (h + 2 * padding - kh) // stride + 1
    ow = (w + 2 * padding - kw) // stride + 1
    hp = h + 2 * padding
    wp = w + 2 * padding

    cin_p = _round_up(cin, 8)          # sublane-aligned contraction dim
    cout_p = _round_up(cout, 128)      # lane-dense output dim (unmasked stores)

    # Pick an output-row tile that divides OH (~<=512 output pixels per tile).
    if block_oh is None:
        cap = max(1, 512 // max(ow, 1))
        block_oh = 1
        for d in range(1, oh + 1):
            if oh % d == 0 and d <= cap:
                block_oh = d
    assert oh % block_oh == 0, "block_oh must divide OH"

    # ---- plain-JAX layout glue (input bytes only, no im2col duplication) ----
    x_nhwc = jnp.transpose(x, (0, 2, 3, 1))
    x_p = jnp.pad(x_nhwc, ((0, 0), (padding, padding), (padding, padding),
                           (0, cin_p - cin)))                       # [N,Hp,Wp,Cin_p]
    w_t = jnp.transpose(weight, (2, 3, 1, 0)).reshape(kh * kw, cin, cout)
    w_p = jnp.pad(w_t, ((0, 0), (0, cin_p - cin), (0, cout_p - cout)))
    b_p = jnp.pad(bias, (0, cout_p - cout)).reshape(1, cout_p)

    kernel = _make_conv_kernel(kh, kw, stride, block_oh, ow, cin_p, cout_p)
    grid = (n, oh // block_oh)

    flops = 2 * n * oh * ow * kh * kw * cin_p * cout_p
    out_bytes = n * oh * ow * cout_p * x.dtype.itemsize
    bytes_accessed = int(x_p.nbytes + w_p.nbytes + b_p.nbytes + out_bytes)

    out_p = pl.pallas_call(
        kernel,
        out_shape=jax.ShapeDtypeStruct((n, oh, ow, cout_p), x.dtype),
        grid_spec=pltpu.PrefetchScalarGridSpec(
            num_scalar_prefetch=0,
            grid=grid,
            in_specs=[
                # Full padded image per batch element; same block across the
                # row-tile axis -> stays resident in VMEM.
                pl.BlockSpec((1, hp, wp, cin_p), lambda b, t: (b, 0, 0, 0)),
                pl.BlockSpec((kh * kw, cin_p, cout_p), lambda b, t: (0, 0, 0)),
                pl.BlockSpec((1, cout_p), lambda b, t: (0, 0)),
            ],
            out_specs=pl.BlockSpec((1, block_oh, ow, cout_p),
                                   lambda b, t: (b, t, 0, 0)),
        ),
        compiler_params=pltpu.CompilerParams(
            dimension_semantics=("parallel", "parallel"),
            vmem_limit_bytes=32 * 1024 * 1024,
        ),
        cost_estimate=pl.CostEstimate(flops=flops, transcendentals=0,
                                      bytes_accessed=bytes_accessed),
    )(x_p, w_p, b_p)

    # Strip Cout padding and return NCHW.
    out = out_p[:, :, :, :cout]
    return jnp.transpose(out, (0, 3, 1, 2))


if __name__ == "__main__":
    # ConvBlock(input_size=4, output_size=8, kernel_size=3, stride=1,
    #           padding=1, activation='relu', norm=None)
    key = jax.random.PRNGKey(0)
    k_x, k_w, k_b = jax.random.split(key, 3)

    N, Cin, H, W = 2, 4, 16, 16
    Cout, KH, KW = 8, 3, 3
    stride, padding = 1, 1

    x = jax.random.normal(k_x, (N, Cin, H, W), dtype=jnp.float32)
    fan_in = Cin * KH * KW
    bound = 1.0 / (fan_in ** 0.5)
    weight = jax.random.uniform(k_w, (Cout, Cin, KH, KW),
                                minval=-bound, maxval=bound, dtype=jnp.float32)
    bias = jax.random.uniform(k_b, (Cout,), minval=-bound, maxval=bound,
                              dtype=jnp.float32)

    # block_oh=8 -> grid (N=2, OH/8=2): exercises the M-tiled, parallel grid.
    out = conv_block_forward(x, weight, bias, stride=stride, padding=padding,
                             block_oh=8)
    out = jax.block_until_ready(out)

    # Sanity check against plain-JAX conv + relu reference.
    ref = jax.lax.conv_general_dilated(
        x, weight, window_strides=(stride, stride),
        padding=((padding, padding), (padding, padding)),
        dimension_numbers=("NCHW", "OIHW", "NCHW"))
    ref = jnp.maximum(ref + bias.reshape(1, Cout, 1, 1), 0.0)
    assert out.shape == (N, Cout, H, W)
    assert jnp.allclose(out, ref, atol=1e-4, rtol=1e-4)

    print("KERNEL_OK")
</pallas_src>

<mosaic_0001>
module attributes {stable_mosaic.version = 11 : i64} {
  func.func @kernel(%arg0: i32, %arg1: i32, %arg2: memref<1x18x18x8xf32, #tpu.memory_space<vmem>>, %arg3: memref<9x8x128xf32, #tpu.memory_space<vmem>>, %arg4: memref<1x128xf32, #tpu.memory_space<vmem>>, %arg5: memref<1x8x16x128xf32, #tpu.memory_space<vmem>>) attributes {dimension_semantics = [#tpu.dimension_semantics<parallel>, #tpu.dimension_semantics<parallel>], iteration_bounds = array<i64: 2, 2>, scalar_prefetch = 0 : i64, scratch_operands = 0 : i64, tpu.core_type = #tpu.core_type<tc>, window_params = [{transform_indices = @transform_0, window_bounds = array<i64: 1, 18, 18, 8>}, {pipeline_mode = #tpu.pipeline_mode<synchronous>, transform_indices = @transform_1, window_bounds = array<i64: 9, 8, 128>}, {pipeline_mode = #tpu.pipeline_mode<synchronous>, transform_indices = @transform_2, window_bounds = array<i64: 1, 128>}, {transform_indices = @transform_3, window_bounds = array<i64: 1, 8, 16, 128>}]} {
    %c8_i32 = arith.constant 8 : i32
    %0 = arith.muli %arg1, %c8_i32 : i32
    %1 = tpu.assume_multiple %0, 8 : i32
    %cst = arith.constant 0.000000e+00 : f32
    %2 = vector.broadcast %cst : f32 to vector<128x128xf32>
    %c0_i32 = arith.constant 0 : i32
    %3 = arith.addi %1, %c0_i32 : i32
    %c0 = arith.constant 0 : index
    %4 = arith.index_cast %3 : i32 to index
    %c0_0 = arith.constant 0 : index
    %c0_1 = arith.constant 0 : index
    %5 = vector.load %arg2[%c0, %4, %c0_0, %c0_1] : memref<1x18x18x8xf32, #tpu.memory_space<vmem>>, vector<1x8x16x8xf32>
    %6 = vector.shape_cast %5 : vector<1x8x16x8xf32> to vector<8x16x8xf32>
    %7 = vector.shape_cast %6 : vector<8x16x8xf32> to vector<128x8xf32>
    %c0_2 = arith.constant 0 : index
    %c0_3 = arith.constant 0 : index
    %c0_4 = arith.constant 0 : index
    %8 = vector.load %arg3[%c0_2, %c0_3, %c0_4] : memref<9x8x128xf32, #tpu.memory_space<vmem>>, vector<1x8x128xf32>
    %9 = vector.shape_cast %8 : vector<1x8x128xf32> to vector<8x128xf32>
    %cst_5 = arith.constant dense<0.000000e+00> : vector<128x128xf32>
    %10 = tpu.matmul %7, %9, %cst_5 {dimension_numbers = #tpu.dot_dimension_numbers<[1], [0], [0], [1], [0, 0, 1, 1], [], []>} : vector<128x8xf32>, vector<8x128xf32>, vector<128x128xf32> -> vector<128x128xf32>
    %11 = arith.addf %2, %10 : vector<128x128xf32>
    %c0_i32_6 = arith.constant 0 : i32
    %12 = arith.addi %1, %c0_i32_6 : i32
    %c0_7 = arith.constant 0 : index
    %13 = arith.index_cast %12 : i32 to index
    %c1 = arith.constant 1 : index
    %c0_8 = arith.constant 0 : index
    %14 = vector.load %arg2[%c0_7, %13, %c1, %c0_8] : memref<1x18x18x8xf32, #tpu.memory_space<vmem>>, vector<1x8x16x8xf32>
    %15 = vector.shape_cast %14 : vector<1x8x16x8xf32> to vector<8x16x8xf32>
    %16 = vector.shape_cast %15 : vector<8x16x8xf32> to vector<128x8xf32>
    %c1_9 = arith.constant 1 : index
    %c0_10 = arith.constant 0 : index
    %c0_11 = arith.constant 0 : index
    %17 = vector.load %arg3[%c1_9, %c0_10, %c0_11] : memref<9x8x128xf32, #tpu.memory_space<vmem>>, vector<1x8x128xf32>
    %18 = vector.shape_cast %17 : vector<1x8x128xf32> to vector<8x128xf32>
    %cst_12 = arith.constant dense<0.000000e+00> : vector<128x128xf32>
    %19 = tpu.matmul %16, %18, %cst_12 {dimension_numbers = #tpu.dot_dimension_numbers<[1], [0], [0], [1], [0, 0, 1, 1], [], []>} : vector<128x8xf32>, vector<8x128xf32>, vector<128x128xf32> -> vector<128x128xf32>
    %20 = arith.addf %11, %19 : vector<128x128xf32>
    %c0_i32_13 = arith.constant 0 : i32
    %21 = arith.addi %1, %c0_i32_13 : i32
    %c0_14 = arith.constant 0 : index
    %22 = arith.index_cast %21 : i32 to index
    %c2 = arith.constant 2 : index
    %c0_15 = arith.constant 0 : index
    %23 = vector.load %arg2[%c0_14, %22, %c2, %c0_15] : memref<1x18x18x8xf32, #tpu.memory_space<vmem>>, vector<1x8x16x8xf32>
    %24 = vector.shape_cast %23 : vector<1x8x16x8xf32> to vector<8x16x8xf32>
    %25 = vector.shape_cast %24 : vector<8x16x8xf32> to vector<128x8xf32>
    %c2_16 = arith.constant 2 : index
    %c0_17 = arith.constant 0 : index
    %c0_18 = arith.constant 0 : index
    %26 = vector.load %arg3[%c2_16, %c0_17, %c0_18] : memref<9x8x128xf32, #tpu.memory_space<vmem>>, vector<1x8x128xf32>
    %27 = vector.shape_cast %26 : vector<1x8x128xf32> to vector<8x128xf32>
    %cst_19 = arith.constant dense<0.000000e+00> : vector<128x128xf32>
    %28 = tpu.matmul %25, %27, %cst_19 {dimension_numbers = #tpu.dot_dimension_numbers<[1], [0], [0], [1], [0, 0, 1, 1], [], []>} : vector<128x8xf32>, vector<8x128xf32>, vector<128x128xf32> -> vector<128x128xf32>
    %29 = arith.addf %20, %28 : vector<128x128xf32>
    %c1_i32 = arith.constant 1 : i32
    %30 = arith.addi %1, %c1_i32 : i32
    %c0_20 = arith.constant 0 : index
    %31 = arith.index_cast %30 : i32 to index
    %c0_21 = arith.constant 0 : index
    %c0_22 = arith.constant 0 : index
    %32 = vector.load %arg2[%c0_20, %31, %c0_21, %c0_22] : memref<1x18x18x8xf32, #tpu.memory_space<vmem>>, vector<1x8x16x8xf32>
    %33 = vector.shape_cast %32 : vector<1x8x16x8xf32> to vector<8x16x8xf32>
    %34 = vector.shape_cast %33 : vector<8x16x8xf32> to vector<128x8xf32>
    %c3 = arith.constant 3 : index
    %c0_23 = arith.constant 0 : index
    %c0_24 = arith.constant 0 : index
    %35 = vector.load %arg3[%c3, %c0_23, %c0_24] : memref<9x8x128xf32, #tpu.memory_space<vmem>>, vector<1x8x128xf32>
    %36 = vector.shape_cast %35 : vector<1x8x128xf32> to vector<8x128xf32>
    %cst_25 = arith.constant dense<0.000000e+00> : vector<128x128xf32>
    %37 = tpu.matmul %34, %36, %cst_25 {dimension_numbers = #tpu.dot_dimension_numbers<[1], [0], [0], [1], [0, 0, 1, 1], [], []>} : vector<128x8xf32>, vector<8x128xf32>, vector<128x128xf32> -> vector<128x128xf32>
    %38 = arith.addf %29, %37 : vector<128x128xf32>
    %c1_i32_26 = arith.constant 1 : i32
    %39 = arith.addi %1, %c1_i32_26 : i32
    %c0_27 = arith.constant 0 : index
    %40 = arith.index_cast %39 : i32 to index
    %c1_28 = arith.constant 1 : index
    %c0_29 = arith.constant 0 : index
    %41 = vector.load %arg2[%c0_27, %40, %c1_28, %c0_29] : memref<1x18x18x8xf32, #tpu.memory_space<vmem>>, vector<1x8x16x8xf32>
    %42 = vector.shape_cast %41 : vector<1x8x16x8xf32> to vector<8x16x8xf32>
    %43 = vector.shape_cast %42 : vector<8x16x8xf32> to vector<128x8xf32>
    %c4 = arith.constant 4 : index
    %c0_30 = arith.constant 0 : index
    %c0_31 = arith.constant 0 : index
    %44 = vector.load %arg3[%c4, %c0_30, %c0_31] : memref<9x8x128xf32, #tpu.memory_space<vmem>>, vector<1x8x128xf32>
    %45 = vector.shape_cast %44 : vector<1x8x128xf32> to vector<8x128xf32>
    %cst_32 = arith.constant dense<0.000000e+00> : vector<128x128xf32>
    %46 = tpu.matmul %43, %45, %cst_32 {dimension_numbers = #tpu.dot_dimension_numbers<[1], [0], [0], [1], [0, 0, 1, 1], [], []>} : vector<128x8xf32>, vector<8x128xf32>, vector<128x128xf32> -> vector<128x128xf32>
    %47 = arith.addf %38, %46 : vector<128x128xf32>
    %c1_i32_33 = arith.constant 1 : i32
    %48 = arith.addi %1, %c1_i32_33 : i32
    %c0_34 = arith.constant 0 : index
    %49 = arith.index_cast %48 : i32 to index
    %c2_35 = arith.constant 2 : index
    %c0_36 = arith.constant 0 : index
    %50 = vector.load %arg2[%c0_34, %49, %c2_35, %c0_36] : memref<1x18x18x8xf32, #tpu.memory_space<vmem>>, vector<1x8x16x8xf32>
    %51 = vector.shape_cast %50 : vector<1x8x16x8xf32> to vector<8x16x8xf32>
    %52 = vector.shape_cast %51 : vector<8x16x8xf32> to vector<128x8xf32>
    %c5 = arith.constant 5 : index
    %c0_37 = arith.constant 0 : index
    %c0_38 = arith.constant 0 : index
    %53 = vector.load %arg3[%c5, %c0_37, %c0_38] : memref<9x8x128xf32, #tpu.memory_space<vmem>>, vector<1x8x128xf32>
    %54 = vector.shape_cast %53 : vector<1x8x128xf32> to vector<8x128xf32>
    %cst_39 = arith.constant dense<0.000000e+00> : vector<128x128xf32>
    %55 = tpu.matmul %52, %54, %cst_39 {dimension_numbers = #tpu.dot_dimension_numbers<[1], [0], [0], [1], [0, 0, 1, 1], [], []>} : vector<128x8xf32>, vector<8x128xf32>, vector<128x128xf32> -> vector<128x128xf32>
    %56 = arith.addf %47, %55 : vector<128x128xf32>
    %c2_i32 = arith.constant 2 : i32
    %57 = arith.addi %1, %c2_i32 : i32
    %c0_40 = arith.constant 0 : index
    %58 = arith.index_cast %57 : i32 to index
    %c0_41 = arith.constant 0 : index
    %c0_42 = arith.constant 0 : index
    %59 = vector.load %arg2[%c0_40, %58, %c0_41, %c0_42] : memref<1x18x18x8xf32, #tpu.memory_space<vmem>>, vector<1x8x16x8xf32>
    %60 = vector.shape_cast %59 : vector<1x8x16x8xf32> to vector<8x16x8xf32>
    %61 = vector.shape_cast %60 : vector<8x16x8xf32> to vector<128x8xf32>
    %c6 = arith.constant 6 : index
    %c0_43 = arith.constant 0 : index
    %c0_44 = arith.constant 0 : index
    %62 = vector.load %arg3[%c6, %c0_43, %c0_44] : memref<9x8x128xf32, #tpu.memory_space<vmem>>, vector<1x8x128xf32>
    %63 = vector.shape_cast %62 : vector<1x8x128xf32> to vector<8x128xf32>
    %cst_45 = arith.constant dense<0.000000e+00> : vector<128x128xf32>
    %64 = tpu.matmul %61, %63, %cst_45 {dimension_numbers = #tpu.dot_dimension_numbers<[1], [0], [0], [1], [0, 0, 1, 1], [], []>} : vector<128x8xf32>, vector<8x128xf32>, vector<128x128xf32> -> vector<128x128xf32>
    %65 = arith.addf %56, %64 : vector<128x128xf32>
    %c2_i32_46 = arith.constant 2 : i32
    %66 = arith.addi %1, %c2_i32_46 : i32
    %c0_47 = arith.constant 0 : index
    %67 = arith.index_cast %66 : i32 to index
    %c1_48 = arith.constant 1 : index
    %c0_49 = arith.constant 0 : index
    %68 = vector.load %arg2[%c0_47, %67, %c1_48, %c0_49] : memref<1x18x18x8xf32, #tpu.memory_space<vmem>>, vector<1x8x16x8xf32>
    %69 = vector.shape_cast %68 : vector<1x8x16x8xf32> to vector<8x16x8xf32>
    %70 = vector.shape_cast %69 : vector<8x16x8xf32> to vector<128x8xf32>
    %c7 = arith.constant 7 : index
    %c0_50 = arith.constant 0 : index
    %c0_51 = arith.constant 0 : index
    %71 = vector.load %arg3[%c7, %c0_50, %c0_51] : memref<9x8x128xf32, #tpu.memory_space<vmem>>, vector<1x8x128xf32>
    %72 = vector.shape_cast %71 : vector<1x8x128xf32> to vector<8x128xf32>
    %cst_52 = arith.constant dense<0.000000e+00> : vector<128x128xf32>
    %73 = tpu.matmul %70, %72, %cst_52 {dimension_numbers = #tpu.dot_dimension_numbers<[1], [0], [0], [1], [0, 0, 1, 1], [], []>} : vector<128x8xf32>, vector<8x128xf32>, vector<128x128xf32> -> vector<128x128xf32>
    %74 = arith.addf %65, %73 : vector<128x128xf32>
    %c2_i32_53 = arith.constant 2 : i32
    %75 = arith.addi %1, %c2_i32_53 : i32
    %c0_54 = arith.constant 0 : index
    %76 = arith.index_cast %75 : i32 to index
    %c2_55 = arith.constant 2 : index
    %c0_56 = arith.constant 0 : index
    %77 = vector.load %arg2[%c0_54, %76, %c2_55, %c0_56] : memref<1x18x18x8xf32, #tpu.memory_space<vmem>>, vector<1x8x16x8xf32>
    %78 = vector.shape_cast %77 : vector<1x8x16x8xf32> to vector<8x16x8xf32>
    %79 = vector.shape_cast %78 : vector<8x16x8xf32> to vector<128x8xf32>
    %c8 = arith.constant 8 : index
    %c0_57 = arith.constant 0 : index
    %c0_58 = arith.constant 0 : index
    %80 = vector.load %arg3[%c8, %c0_57, %c0_58] : memref<9x8x128xf32, #tpu.memory_space<vmem>>, vector<1x8x128xf32>
    %81 = vector.shape_cast %80 : vector<1x8x128xf32> to vector<8x128xf32>
    %cst_59 = arith.constant dense<0.000000e+00> : vector<128x128xf32>
    %82 = tpu.matmul %79, %81, %cst_59 {dimension_numbers = #tpu.dot_dimension_numbers<[1], [0], [0], [1], [0, 0, 1, 1], [], []>} : vector<128x8xf32>, vector<8x128xf32>, vector<128x128xf32> -> vector<128x128xf32>
    %83 = arith.addf %74, %82 : vector<128x128xf32>
    %c0_60 = arith.constant 0 : index
    %c0_61 = arith.constant 0 : index
    %84 = vector.load %arg4[%c0_60, %c0_61] : memref<1x128xf32, #tpu.memory_space<vmem>>, vector<1x128xf32>
    %85 = vector.broadcast %84 : vector<1x128xf32> to vector<128x128xf32>
    %86 = arith.addf %83, %85 : vector<128x128xf32>
    %cst_62 = arith.constant 0.000000e+00 : f32
    %87 = vector.broadcast %cst_62 : f32 to vector<128x128xf32>
    %88 = arith.maximumf %86, %87 : vector<128x128xf32>
    %89 = vector.shape_cast %88 : vector<128x128xf32> to vector<8x16x128xf32>
    %c0_63 = arith.constant 0 : index
    %c0_64 = arith.constant 0 : index
    %c0_65 = arith.constant 0 : index
    %c0_66 = arith.constant 0 : index
    %90 = vector.load %arg5[%c0_63, %c0_64, %c0_65, %c0_66] : memref<1x8x16x128xf32, #tpu.memory_space<vmem>>, vector<1x8x16x128xf32>
    %91 = vector.shape_cast %90 : vector<1x8x16x128xf32> to vector<8x16x128xf32>
    %92 = vector.shape_cast %89 : vector<8x16x128xf32> to vector<1x8x16x128xf32>
    tpu.vector_store %arg5[%c0_63, %c0_64, %c0_65, %c0_66], %92 {strides = array<i32>} : memref<1x8x16x128xf32, #tpu.memory_space<vmem>>, vector<1x8x16x128xf32>,
    return
  }
  func.func @transform_0(%arg0: i32, %arg1: i32) -> (i32, i32, i32, i32) {
    %c0_i32 = arith.constant 0 : i32
    %c0_i32_0 = arith.constant 0 : i32
    %c0_i32_1 = arith.constant 0 : i32
    %c0_i32_2 = arith.constant 0 : i32
    return %arg0, %c0_i32, %c0_i32_0, %c0_i32_1 : i32, i32, i32, i32
  }
  func.func @transform_1(%arg0: i32, %arg1: i32) -> (i32, i32, i32) {
    %c0_i32 = arith.constant 0 : i32
    %c0_i32_0 = arith.constant 0 : i32
    %c0_i32_1 = arith.constant 0 : i32
    %c0_i32_2 = arith.constant 0 : i32
    return %c0_i32, %c0_i32_0, %c0_i32_1 : i32, i32, i32
  }
  func.func @transform_2(%arg0: i32, %arg1: i32) -> (i32, i32) {
    %c0_i32 = arith.constant 0 : i32
    %c0_i32_0 = arith.constant 0 : i32
    %c0_i32_1 = arith.constant 0 : i32
    return %c0_i32, %c0_i32_0 : i32, i32
  }
  func.func @transform_3(%arg0: i32, %arg1: i32) -> (i32, i32, i32, i32) {
    %c0_i32 = arith.constant 0 : i32
    %c0_i32_0 = arith.constant 0 : i32
    %c0_i32_1 = arith.constant 0 : i32
    return %arg0, %arg1, %c0_i32, %c0_i32_0 : i32, i32, i32, i32
  }
}

</mosaic_0001>

<bundles_post_ra>
// kernel: tpu_custom_call.1
= control target key start
LH: loop header
LB: loop body
LE: loop exit
PB: predicated region body
PF: predicated region fallthrough
CT: control target
= control target key end

     0   :  { %8 = vsyncpa [#allocation3], 0  ;;  %s3980_s0 = inlined_call_operand.vmem [shape: f32[2,18,18,8], index: 0, kind: input, shape index: {}]   ;;  %s3981_s1 = inlined_call_operand.vmem [shape: f32[9,8,128], index: 1, kind: input, shape index: {}]   ;;  %s3982_s2 = inlined_call_operand.vmem [shape: f32[1,128], index: 2, kind: input, shape index: {}]   ;;  %s3983_s3 = inlined_call_operand.hbm [shape: f32[2,16,16,128], index: 3, kind: output, shape index: {}]  }
   0x1   :  { %10 = vsyncpa [#allocation3 + $0x1], 0  ;;  %s3342_s12 = smov 0   ;;  %s3344_s13 = smov 0  }
   0x2   :  { %s3346_s14 = smov 0   ;;  %s3348_s15 = smov 0  }
   0x3   :  { %s3350_s16 = smov 0   ;;  %s3352_s17 = smov 0  }
   0x4   :  { %s3354_s18 = smov 0   ;;  %s3356_s19 = smov 0  }
   0x5 LB: > { %s2362_s20 = sadd.s32 4294967295, %s3317_s19   ;;  %s2363_s21 = sadd.s32 4294967294, %s3317_s19   ;;  %s3317_s19 = sphi %s3356_s19, %s16_s19   ;;  %s3313_s18 = sphi %s3354_s18, %s3992_s18   ;;  %s3309_s17 = sphi %s3352_s17, %s3991_s17   ;;  %s3305_s16 = sphi %s3350_s16, %s3990_s16   ;;  %s3301_s15 = sphi %s3348_s15, %s3989_s15   ;;  %s3297_s14 = sphi %s3346_s14, %s3988_s14   ;;  %s3293_s13 = sphi %s3344_s13, %s3987_s13   ;;  %s3289_s12 = sphi %s3342_s12, %s3986_s12  }
   0x6   : > { %s25_s22 = sadd.s32 1, %s3309_s17  ;;  %s28_s23 = sadd.s32 1, %s3313_s18 }
   0x7   : > { %p26_p0 = scmp.ge.s32.totalorder %s25_s22, 2  ;;  %p115_p1 = scmp.ne.s32.totalorder %s3297_s14, %s3293_s13 }
   0x8   : > { %p116_p2 = scmp.eq.s32.totalorder %s2362_s20, 3  ;;  %p121_p5 = scmp.ne.s32.totalorder %s3293_s13, %s3289_s12 }
   0x9   : > { %s3994_s22 = smov (%p26_p0, %s25_s22), 0  ;;  %s3996_s23 = smov (!%p26_p0, %s28_s23), %s3313_s18 }
   0xa   : > { %s101_s24 = ssub.s32 %s3309_s17, %s3994_s22  ;;  %p3393_p3 = por %p116_p2, %p115_p1 }
   0xb   : > { %p30_p4 = scmp.ge.s32.totalorder %s3996_s23, 2  ;;  %p122_p6 = scmp.eq.s32.totalorder %s2363_s21, 3 }
   0xc   : > { %p2366_p7 = scmp.ge.s32.totalorder %s3317_s19, 1  ;;  %p154_p9 = scmp.lt.s32.totalorder %s3317_s19, 5 }
   0xd   : > { %s3998_s23 = smov (%p30_p4, %s3996_s23), 0  ;;  %p3402_p8 = por %p122_p6, %p121_p5 }
   0xe   : > { %s100_s27 = ssub.s32 %s3313_s18, %s3998_s23  ;;  %s105_s28 = sadd.s32 1, %s3297_s14 }
   0xf   : > { %s102_s29 = sor.u32 %s101_s24, %s100_s27  ;;  %p155_p10 = pnand %p2366_p7, %p154_p9 }
  0x10   : > { %p103_p11 = scmp.eq.s32.totalorder %s102_s29, 0  ;;  %v2371_v0 = vld [vmem:[%s3981_s1 + $0x8] sm:$0xff] (!%p155_p10)  ;;  %v3419_v1 = vld [vmem:[%s3981_s1 + $0x20] sm:$0xff] (!%p155_p10)  ;;  %p178_p12 = scmp.lt.s32.totalorder (!%p155_p10), %s3305_s16, 1  ;;  %vm222_vm0 = vcmask (!%p155_p10), 64512   ;;  %v2540_v9 = vld [vmem:[%s3981_s1 + $0x30] sm:$0xff] (!%p155_p10) }
  0x11   : > { %158 = sbr.rel (%p155_p10) target bundleno = 406 (0x196), region = 32  ;;  %v203_v2 = vld [vmem:[%s3981_s1] sm:$0xff] (!%p155_p10)  ;;  %2785 = vmatprep.subr.mxu1 (!%p155_p10), %v2371_v0  ;;  %2889 = vmatprep.subr.mxu0 (!%p155_p10), %v3419_v1  ;;  %v2505_v3 = vld [vmem:[%s3981_s1 + $0x28] sm:$0xff] (!%p155_p10)  ;;  %v3454_v10 = vld [vmem:[%s3981_s1 + $0x10] sm:$0xff] (!%p155_p10)  ;;  %s175_s27 = sand.u32 (!%p155_p10), 1, %s3293_s13  }
  0x12   : > { %s3411_s30 = scalar_select %p103_p11, %s3297_s14, %s105_s28  }
  0x13   : > { %2786 = vmatpush3.msra.mxu1 (!%p155_p10), %v2371_v0  ;;  %2890 = vmatpush3.msra.mxu0 (!%p155_p10), %v3419_v1  ;;  %s2370_s21 = smul.u32 (!%p155_p10), 192, %s3301_s15  ;;  %v3513_v20 = vld [vmem:[%s3981_s1 + $0x38] sm:$0xff] (!%p155_p10)  ;;  %v2606_v51 = vld [vmem:[%s3981_s1 + $0x40] sm:$0xff] (!%p155_p10)  ;;  %s2631_s6 = sshll.u32 (!%p155_p10), %s3301_s15, 4 }
  0x14   : > { %2811 = vmatprep.subr.mxu1 (!%p155_p10), %v203_v2  ;;  %2915 = vmatprep.subr.mxu0 (!%p155_p10), %v2505_v3  ;;  %v2439_v37 = vld [vmem:[%s3981_s1 + $0x18] sm:$0xff] (!%p155_p10)  ;;  %s2627_s7 = sshll.u32 (!%p155_p10), %s3305_s16, 5 }
  0x15   : > { %s2273_s8 = sadd.s32 (!%p155_p10), %s2631_s6, %s2627_s7 }
  0x16   : > { %s2628_s15 = sshll.u32 (!%p155_p10), %s2273_s8, 7 }
  0x17   : > { %s3920_s11 = scalar_lea.hbm (!%p155_p10), %s3983_s3, %s2628_s15 }
  0x18   : > { %s179_s20 = scalar_select %p178_p12, %s3305_s16, 1 }
  0x1a   : > { %s3149_s24 = smul.u32 432, %s179_s20  ;;  %s3928_s20 = scalar_lea.sflag [#allocation3], %s175_s27 }
  0x1c   : > { %s182_s29 = scalar_lea.vmem %s3980_s0, %s3149_s24  ;;  %s3319_s24 = smov [#allocation2]  }
  0x1d   : > { %s3435_s4 = scalar_lea.vmem %s182_s29, %s2370_s21  ;;  %s3227_s28 = sshll.u32 %s3319_s24, 4  ;;  %s3228_s28 = int_to_ptr.vmem [resolvable:$false] %s3227_s28 }
  0x1e   : > { %v204_v4 = vld [vmem:[%s3435_s4 + $0x1] sm:$0xff]  ;;  %v2456_v5 = vld [vmem:[%s3435_s4 + $0x19] sm:$0xff]  ;;  %v205_v6 = vld [vmem:[%s3435_s4 + $0x9] sm:$0xff]  ;;  %s3229_s29 = scalar_lea.vmem %s3228_s28, 4096 }
  0x1f   : > { %2787 = vmatprep.mubr.msk.f32.mxu1 %vm222_vm0, %v204_v4  ;;  %2891 = vmatprep.mubr.msk.f32.mxu0 %vm222_vm0, %v2456_v5  ;;  %v2457_v7 = vld [vmem:[%s3435_s4 + $0x21] sm:$0xff]  ;;  %v3444_v8 = vld [vmem:[%s3435_s4 + $0x31] sm:$0xff]  ;;  %v3457_v11 = vld [vmem:[%s3435_s4 + $0x39] sm:$0xff] }
  0x20   : > { %2788 = vmatmul.mubr.msk.f32.vlgmr.msra.gmra.mrb[0].mxu1 %vm222_vm0, %v205_v6  ;;  %2892 = vmatmul.mubr.msk.f32.vlgmr.msra.gmra.mrb[0].mxu0 %vm222_vm0, %v2457_v7  ;;  %v3463_v12 = vld [vmem:[%s3435_s4 + $0x49] sm:$0xff]  ;;  %v3474_v13 = vld [vmem:[%s3435_s4 + $0x51] sm:$0xff]  ;;  %v3477_v14 = vld [vmem:[%s3435_s4 + $0x61] sm:$0xff] }
  0x21   : > { %2812 = vmatpush3.msra.mxu1 %v203_v2  ;;  %2916 = vmatpush3.msra.mxu0 %v2505_v3  ;;  %v3488_v15 = vld [vmem:[%s3435_s4 + $0x69] sm:$0xff]  ;;  %v3491_v16 = vld [vmem:[%s3435_s4 + $0x1a] sm:$0xff]  ;;  %v3508_v19 = vld [vmem:[%s3435_s4 + $0x32] sm:$0xff] }
  0x22   : > { %2790 = vmatprep.mubr.msk.f32.mxu1 %vm222_vm0, %v2456_v5  ;;  %2894 = vmatprep.mubr.msk.f32.mxu0 %vm222_vm0, %v3444_v8  ;;  %v3502_v17 = vld [vmem:[%s3435_s4 + $0x22] sm:$0xff]  ;;  %v3505_v18 = vld [vmem:[%s3435_s4 + $0x79] sm:$0xff]  ;;  %v3530_v23 = vld [vmem:[%s3435_s4 + $0x91] sm:$0xff] }
  0x23   : > { %2941 = vmatprep.subr.mxu0 %v2540_v9  ;;  %2837 = vmatprep.subr.mxu1 %v3454_v10  ;;  %v3522_v21 = vld [vmem:[%s3435_s4 + $0x81] sm:$0xff]  ;;  %v3533_v24 = vld [vmem:[%s3435_s4 + $0x4a] sm:$0xff]  ;;  %v3545_v25 = vld [vmem:[%s3435_s4 + $0x99] sm:$0xff] }
  0x24   : > { %2791 = vmatmul.mubr.msk.f32.gmra.mrb[2].mxu1 %vm222_vm0, %v2457_v7  ;;  %2895 = vmatmul.mubr.msk.f32.gmra.mrb[2].mxu0 %vm222_vm0, %v3457_v11  ;;  %v3525_v22 = vld [vmem:[%s3435_s4 + $0x3a] sm:$0xff]  ;;  %v3548_v26 = vld [vmem:[%s3435_s4 + $0x52] sm:$0xff]  ;;  %v3551_v27 = vld [vmem:[%s3435_s4 + $0xa9] sm:$0xff] }
  0x25   : > { %2793 = vmatprep.mubr.msk.f32.mxu1 %vm222_vm0, %v3444_v8  ;;  %2897 = vmatprep.mubr.msk.f32.mxu0 %vm222_vm0, %v3463_v12  ;;  %v3554_v28 = vld [vmem:[%s3435_s4 + $0x62] sm:$0xff]  ;;  %v3565_v29 = vld [vmem:[%s3435_s4 + $0xb1] sm:$0xff]  ;;  %v3572_v32 = vld [vmem:[%s3435_s4 + $0x7a] sm:$0xff] }
  0x26   : > { %v3568_v30 = vld [vmem:[%s3435_s4 + $0x6a] sm:$0xff]  ;;  %v187_v31 = vld [vmem:[%s3435_s4] sm:$0xff]  ;;  %v3586_v35 = vld [vmem:[%s3435_s4 + $0x18] sm:$0xff] }
  0x27   : > { %v188_v33 = vld [vmem:[%s3435_s4 + $0x8] sm:$0xff]  ;;  %v3589_v36 = vld [vmem:[%s3435_s4 + $0x92] sm:$0xff]  ;;  %v3601_v38 = vld [vmem:[%s3435_s4 + $0x20] sm:$0xff] }
  0x28   : > { %2794 = vmatmul.mubr.msk.f32.gmra.mrb[4].mxu1 %vm222_vm0, %v3457_v11  ;;  %2898 = vmatmul.mubr.msk.f32.gmra.mrb[4].mxu0 %vm222_vm0, %v3474_v13  ;;  %v3583_v34 = vld [vmem:[%s3435_s4 + $0x82] sm:$0xff]  ;;  %v3604_v39 = vld [vmem:[%s3435_s4 + $0x9a] sm:$0xff]  ;;  %v3609_v40 = vld [vmem:[%s3435_s4 + $0x30] sm:$0xff] }
  0x29   : > { %2796 = vmatprep.mubr.msk.f32.mxu1 %vm222_vm0, %v3463_v12  ;;  %2900 = vmatprep.mubr.msk.f32.mxu0 %vm222_vm0, %v3477_v14  ;;  %v3612_v41 = vld [vmem:[%s3435_s4 + $0xaa] sm:$0xff]  ;;  %v3623_v42 = vld [vmem:[%s3435_s4 + $0x38] sm:$0xff]  ;;  %v3632_v45 = vld [vmem:[%s3435_s4 + $0xc2] sm:$0xff] }
  0x2a   : > { %v3626_v43 = vld [vmem:[%s3435_s4 + $0xb2] sm:$0xff]  ;;  %v3629_v44 = vld [vmem:[%s3435_s4 + $0x48] sm:$0xff]  ;;  %v3649_v48 = vld [vmem:[%s3435_s4 + $0x60] sm:$0xff] }
  0x2b   : > { %v3643_v46 = vld [vmem:[%s3435_s4 + $0x50] sm:$0xff]  ;;  %v3660_v49 = vld [vmem:[%s3435_s4 + $0x68] sm:$0xff]  ;;  %v3663_v50 = vld [vmem:[%s3435_s4 + $0x78] sm:$0xff] }
  0x2c   : > { %2797 = vmatmul.mubr.msk.f32.gmra.mrb[6].mxu1 %vm222_vm0, %v3474_v13  ;;  %2901 = vmatmul.mubr.msk.f32.gmra.mrb[6].mxu0 %vm222_vm0, %v3488_v15  ;;  %v3646_v47 = vld [vmem:[%s3435_s4 + $0xca] sm:$0xff]  ;;  %v3676_v52 = vld [vmem:[%s3435_s4 + $0x80] sm:$0xff]  ;;  %v3692_v54 = vld [vmem:[%s3435_s4 + $0x98] sm:$0xff] }
  0x2d   : > { %2799 = vmatprep.mubr.msk.f32.mxu1 %vm222_vm0, %v3477_v14  ;;  %2917 = vmatprep.mubr.msk.f32.mxu0 %vm222_vm0, %v3491_v16  ;;  %v3681_v53 = vld [vmem:[%s3435_s4 + $0x90] sm:$0xff]  ;;  %v3695_v55 = vld [vmem:[%s3435_s4 + $0xa8] sm:$0xff]  ;;  %v3725_v59 = vld [vmem:[%s3435_s4 + $0xc0] sm:$0xff] }
  0x2e   : > { %v3706_v56 = vld [vmem:[%s3435_s4 + $0xb0] sm:$0xff]  ;;  %v609_v57 = vld [vmem:[%s3435_s4 + $0x2] sm:$0xff]  ;;  %v2538_v61 = vld [vmem:[%s3435_s4 + $0xd8] sm:$0xff] }
  0x2f   : > { %v610_v58 = vld [vmem:[%s3435_s4 + $0xa] sm:$0xff]  ;;  %v2539_v62 = vld [vmem:[%s3435_s4 + $0xe0] sm:$0xff] }
  0x30   : > { %2800 = vmatmul.mubr.msk.f32.gmra.mrb[8].mxu1 %vm222_vm0, %v3488_v15  ;;  %2918 = vmatmul.mubr.msk.f32.vlgmr.msra.gmra.mrb[0].mxu0 %vm222_vm0, %v3502_v17  ;;  %v2537_v60 = vld [vmem:[%s3435_s4 + $0xc8] sm:$0xff]  ;;  %v2604_v3 = vld [vmem:[%s3435_s4 + $0xda] sm:$0xff] }
  0x31   : > { %2942 = vmatpush3.msra.mxu0 %v2540_v9  ;;  %2802 = vmatprep.mubr.msk.f32.mxu1 %vm222_vm0, %v3505_v18  ;;  %v2569_v63 = vld [vmem:[%s3435_s4 + $0xc1] sm:$0xff]  ;;  %v2570_v0 = vld [vmem:[%s3435_s4 + $0xc9] sm:$0xff] }
  0x32   : > { %2920 = vmatprep.mubr.msk.f32.mxu0 %vm222_vm0, %v3508_v19  ;;  %2967 = vmatprep.subr.mxu0 %v3513_v20  ;;  %v2572_v2 = vld [vmem:[%s3435_s4 + $0xe1] sm:$0xff] }
  0x33   : > { %v2605_v4 = vld [vmem:[%s3435_s4 + $0xe2] sm:$0xff] }
  0x34   : > { %2803 = vmatmul.mubr.msk.f32.gmra.mrb[10].mxu1 %vm222_vm0, %v3522_v21  ;;  %2921 = vmatmul.mubr.msk.f32.gmra.mrb[2].mxu0 %vm222_vm0, %v3525_v22 }
  0x35   : > { %2805 = vmatprep.mubr.msk.f32.mxu1 %vm222_vm0, %v3530_v23  ;;  %2923 = vmatprep.mubr.msk.f32.mxu0 %vm222_vm0, %v3533_v24 }
  0x38   : > { %2806 = vmatmul.mubr.msk.f32.gmra.mrb[12].mxu1 %vm222_vm0, %v3545_v25  ;;  %2924 = vmatmul.mubr.msk.f32.gmra.mrb[4].mxu0 %vm222_vm0, %v3548_v26 }
  0x39   : > { %2808 = vmatprep.mubr.msk.f32.mxu1 %vm222_vm0, %v3551_v27  ;;  %2926 = vmatprep.mubr.msk.f32.mxu0 %vm222_vm0, %v3554_v28 }
  0x3c   : > { %2809 = vmatmul.mubr.msk.f32.gmra.mrb[14].mxu1 %vm222_vm0, %v3565_v29  ;;  %2927 = vmatmul.mubr.msk.f32.gmra.mrb[6].mxu0 %vm222_vm0, %v3568_v30 }
  0x3d   : > { %2813 = vmatprep.mubr.msk.f32.mxu1 %vm222_vm0, %v187_v31  ;;  %2929 = vmatprep.mubr.msk.f32.mxu0 %vm222_vm0, %v3572_v32 }
  0x40   : > { %2814 = vmatmul.mubr.msk.f32.vlgmr.msra.gmra.mrb[0].mxu1 %vm222_vm0, %v188_v33  ;;  %2930 = vmatmul.mubr.msk.f32.gmra.mrb[8].mxu0 %vm222_vm0, %v3583_v34 }
  0x41   : > { %2838 = vmatpush3.msra.mxu1 %v3454_v10  ;;  %2816 = vmatprep.mubr.msk.f32.mxu1 %vm222_vm0, %v3586_v35 }
  0x42   : > { %2932 = vmatprep.mubr.msk.f32.mxu0 %vm222_vm0, %v3589_v36  ;;  %2863 = vmatprep.subr.mxu1 %v2439_v37 }
  0x44   : > { %2817 = vmatmul.mubr.msk.f32.gmra.mrb[2].mxu1 %vm222_vm0, %v3601_v38  ;;  %2933 = vmatmul.mubr.msk.f32.gmra.mrb[10].mxu0 %vm222_vm0, %v3604_v39 }
  0x45   : > { %2819 = vmatprep.mubr.msk.f32.mxu1 %vm222_vm0, %v3609_v40  ;;  %2935 = vmatprep.mubr.msk.f32.mxu0 %vm222_vm0, %v3612_v41 }
  0x48   : > { %2820 = vmatmul.mubr.msk.f32.gmra.mrb[4].mxu1 %vm222_vm0, %v3623_v42  ;;  %2936 = vmatmul.mubr.msk.f32.gmra.mrb[12].mxu0 %vm222_vm0, %v3626_v43 }
  0x49   : > { %2822 = vmatprep.mubr.msk.f32.mxu1 %vm222_vm0, %v3629_v44  ;;  %2938 = vmatprep.mubr.msk.f32.mxu0 %vm222_vm0, %v3632_v45 }
  0x4c   : > { %2823 = vmatmul.mubr.msk.f32.gmra.mrb[6].mxu1 %vm222_vm0, %v3643_v46  ;;  %2939 = vmatmul.mubr.msk.f32.gmra.mrb[14].mxu0 %vm222_vm0, %v3646_v47 }
  0x4d   : > { %2825 = vmatprep.mubr.msk.f32.mxu1 %vm222_vm0, %v3649_v48  ;;  %2943 = vmatprep.mubr.msk.f32.mxu0 %vm222_vm0, %v3609_v40 }
  0x50   : > { %2826 = vmatmul.mubr.msk.f32.gmra.mrb[8].mxu1 %vm222_vm0, %v3660_v49  ;;  %2944 = vmatmul.mubr.msk.f32.vlgmr.msra.gmra.mrb[0].mxu0 %vm222_vm0, %v3623_v42 }
  0x51   : > { %2968 = vmatpush3.msra.mxu0 %v3513_v20  ;;  %2828 = vmatprep.mubr.msk.f32.mxu1 %vm222_vm0, %v3663_v50 }
  0x52   : > { %2946 = vmatprep.mubr.msk.f32.mxu0 %vm222_vm0, %v3629_v44  ;;  %2993 = vmatprep.subr.mxu0 %v2606_v51 }
  0x54   : > { %2829 = vmatmul.mubr.msk.f32.gmra.mrb[10].mxu1 %vm222_vm0, %v3676_v52  ;;  %2947 = vmatmul.mubr.msk.f32.gmra.mrb[2].mxu0 %vm222_vm0, %v3643_v46 }
  0x55   : > { %2831 = vmatprep.mubr.msk.f32.mxu1 %vm222_vm0, %v3681_v53  ;;  %2949 = vmatprep.mubr.msk.f32.mxu0 %vm222_vm0, %v3649_v48 }
  0x58   : > { %2832 = vmatmul.mubr.msk.f32.gmra.mrb[12].mxu1 %vm222_vm0, %v3692_v54  ;;  %2950 = vmatmul.mubr.msk.f32.gmra.mrb[4].mxu0 %vm222_vm0, %v3660_v49 }
  0x59   : > { %2834 = vmatprep.mubr.msk.f32.mxu1 %vm222_vm0, %v3695_v55  ;;  %2952 = vmatprep.mubr.msk.f32.mxu0 %vm222_vm0, %v3663_v50 }
  0x5c   : > { %2835 = vmatmul.mubr.msk.f32.gmra.mrb[14].mxu1 %vm222_vm0, %v3706_v56  ;;  %2953 = vmatmul.mubr.msk.f32.gmra.mrb[6].mxu0 %vm222_vm0, %v3676_v52 }
  0x5d   : > { %2839 = vmatprep.mubr.msk.f32.mxu1 %vm222_vm0, %v609_v57  ;;  %2955 = vmatprep.mubr.msk.f32.mxu0 %vm222_vm0, %v3681_v53 }
  0x60   : > { %2840 = vmatmul.mubr.msk.f32.vlgmr.msra.gmra.mrb[0].mxu1 %vm222_vm0, %v610_v58  ;;  %2956 = vmatmul.mubr.msk.f32.gmra.mrb[8].mxu0 %vm222_vm0, %v3692_v54 }
  0x61   : > { %2864 = vmatpush3.msra.mxu1 %v2439_v37  ;;  %2842 = vmatprep.mubr.msk.f32.mxu1 %vm222_vm0, %v3491_v16 }
  0x62   : > { %2958 = vmatprep.mubr.msk.f32.mxu0 %vm222_vm0, %v3695_v55  ;;  %3019 = vmatprep.subr.mxu1 %v3419_v1 }
  0x64   : > { %2843 = vmatmul.mubr.msk.f32.gmra.mrb[2].mxu1 %vm222_vm0, %v3502_v17  ;;  %2959 = vmatmul.mubr.msk.f32.gmra.mrb[10].mxu0 %vm222_vm0, %v3706_v56 }
  0x65   : > { %2845 = vmatprep.mubr.msk.f32.mxu1 %vm222_vm0, %v3508_v19  ;;  %2961 = vmatprep.mubr.msk.f32.mxu0 %vm222_vm0, %v3725_v59 }
  0x68   : > { %2846 = vmatmul.mubr.msk.f32.gmra.mrb[4].mxu1 %vm222_vm0, %v3525_v22  ;;  %2962 = vmatmul.mubr.msk.f32.gmra.mrb[12].mxu0 %vm222_vm0, %v2537_v60 }
  0x69   : > { %2848 = vmatprep.mubr.msk.f32.mxu1 %vm222_vm0, %v3533_v24  ;;  %2964 = vmatprep.mubr.msk.f32.mxu0 %vm222_vm0, %v2538_v61 }
  0x6c   : > { %2849 = vmatmul.mubr.msk.f32.gmra.mrb[6].mxu1 %vm222_vm0, %v3548_v26  ;;  %2965 = vmatmul.mubr.msk.f32.gmra.mrb[14].mxu0 %vm222_vm0, %v2539_v62 }
  0x6d   : > { %2851 = vmatprep.mubr.msk.f32.mxu1 %vm222_vm0, %v3554_v28  ;;  %2969 = vmatprep.mubr.msk.f32.mxu0 %vm222_vm0, %v3444_v8 }
  0x70   : > { %2852 = vmatmul.mubr.msk.f32.gmra.mrb[8].mxu1 %vm222_vm0, %v3568_v30  ;;  %2970 = vmatmul.mubr.msk.f32.vlgmr.msra.gmra.mrb[0].mxu0 %vm222_vm0, %v3457_v11 }
  0x71   : > { %2994 = vmatpush3.msra.mxu0 %v2606_v51  ;;  %2854 = vmatprep.mubr.msk.f32.mxu1 %vm222_vm0, %v3572_v32 }
  0x72   : > { %2972 = vmatprep.mubr.msk.f32.mxu0 %vm222_vm0, %v3463_v12 }
  0x74   : > { %2855 = vmatmul.mubr.msk.f32.gmra.mrb[10].mxu1 %vm222_vm0, %v3583_v34  ;;  %2973 = vmatmul.mubr.msk.f32.gmra.mrb[2].mxu0 %vm222_vm0, %v3474_v13 }
  0x75   : > { %2857 = vmatprep.mubr.msk.f32.mxu1 %vm222_vm0, %v3589_v36  ;;  %2975 = vmatprep.mubr.msk.f32.mxu0 %vm222_vm0, %v3477_v14  ;;  %v3878_v14 = vld [vmem:[%s3982_s2] ss:$0 sm:$0xff] }
  0x78   : > { %2858 = vmatmul.mubr.msk.f32.gmra.mrb[12].mxu1 %vm222_vm0, %v3604_v39  ;;  %2976 = vmatmul.mubr.msk.f32.gmra.mrb[4].mxu0 %vm222_vm0, %v3488_v15 }
  0x79   : > { %2860 = vmatprep.mubr.msk.f32.mxu1 %vm222_vm0, %v3612_v41  ;;  %2978 = vmatprep.mubr.msk.f32.mxu0 %vm222_vm0, %v3505_v18 }
  0x7c   : > { %2861 = vmatmul.mubr.msk.f32.gmra.mrb[14].mxu1 %vm222_vm0, %v3626_v43  ;;  %2979 = vmatmul.mubr.msk.f32.gmra.mrb[6].mxu0 %vm222_vm0, %v3522_v21 }
  0x7d   : > { %2865 = vmatprep.mubr.msk.f32.mxu1 %vm222_vm0, %v3586_v35  ;;  %2981 = vmatprep.mubr.msk.f32.mxu0 %vm222_vm0, %v3530_v23 }
  0x80   : > { %2866 = vmatmul.mubr.msk.f32.vlgmr.msra.gmra.mrb[0].mxu1 %vm222_vm0, %v3601_v38  ;;  %2982 = vmatmul.mubr.msk.f32.gmra.mrb[8].mxu0 %vm222_vm0, %v3545_v25 }
  0x81   : > { %3020 = vmatpush3.msra.mxu1 %v3419_v1  ;;  %2868 = vmatprep.mubr.msk.f32.mxu1 %vm222_vm0, %v3609_v40  ;;  %v2571_v1 = vld [vmem:[%s3435_s4 + $0xd9] sm:$0xff]  ;;  %s2367_s4 = sshll.u32 %s175_s27, 7 }
  0x82   : > { %2984 = vmatprep.mubr.msk.f32.mxu0 %vm222_vm0, %v3551_v27  ;;  %s3884_s5 = scalar_lea.vmem [#allocation2], %s2367_s4 }
  0x83   : > { %s2276_s16 = sshll.u32 %s3884_s5, 4  ;;  %s3922_s16 = int_to_ptr.vmem [resolvable:$true] %s2276_s16 }
  0x84   : > { %2869 = vmatmul.mubr.msk.f32.gmra.mrb[2].mxu1 %vm222_vm0, %v3623_v42  ;;  %2985 = vmatmul.mubr.msk.f32.gmra.mrb[10].mxu0 %vm222_vm0, %v3565_v29  ;;  %s3223_s21 = scalar_lea.vmem %s3922_s16, 2048  ;;  %p3230_p2 = scmp.lt.s32.totalorder %s3922_s16, %s3228_s28 }
  0x85   : > { %2871 = vmatprep.mubr.msk.f32.mxu1 %vm222_vm0, %v3629_v44  ;;  %2987 = vmatprep.mubr.msk.f32.mxu0 %vm222_vm0, %v2569_v63  ;;  %p3224_p13 = scmp.ne.s32.totalorder %s3922_s16, %s3223_s21  ;;  %p3231_p4 = scmp.lt.s32.totalorder %s3229_s29, %s3223_s21 }
  0x87   : > { %p3225_p0 = pnand %p3224_p13, %p3393_p3  ;;  %p3232_p5 = por %p3231_p4, %p3230_p2 }
  0x88   : > { %2872 = vmatmul.mubr.msk.f32.gmra.mrb[4].mxu1 %vm222_vm0, %v3643_v46  ;;  %2988 = vmatmul.mubr.msk.f32.gmra.mrb[12].mxu0 %vm222_vm0, %v2570_v0 }
  0x89   : > { %2874 = vmatprep.mubr.msk.f32.mxu1 %vm222_vm0, %v3649_v48  ;;  %2990 = vmatprep.mubr.msk.f32.mxu0 %vm222_vm0, %v2571_v1  ;;  %p3226_p1 = pneg %p3225_p0 }
  0x8b   : > { %p3233_p6 = pnand %p3232_p5, %p3226_p1 }
  0x8c   : > { %2875 = vmatmul.mubr.msk.f32.gmra.mrb[6].mxu1 %vm222_vm0, %v3660_v49  ;;  %2991 = vmatmul.mubr.msk.f32.gmra.mrb[14].mxu0 %vm222_vm0, %v2572_v2 }
  0x8d   : > { %2877 = vmatprep.mubr.msk.f32.mxu1 %vm222_vm0, %v3663_v50  ;;  %2995 = vmatprep.mubr.msk.f32.mxu0 %vm222_vm0, %v3508_v19 }
  0x90   : > { %2878 = vmatmul.mubr.msk.f32.gmra.mrb[8].mxu1 %vm222_vm0, %v3676_v52  ;;  %2996 = vmatmul.mubr.msk.f32.vlgmr.msra.gmra.mrb[0].mxu0 %vm222_vm0, %v3525_v22 }
  0x91   : > { %2880 = vmatprep.mubr.msk.f32.mxu1 %vm222_vm0, %v3681_v53  ;;  %2998 = vmatprep.mubr.msk.f32.mxu0 %vm222_vm0, %v3533_v24 }
  0x94   : > { %2881 = vmatmul.mubr.msk.f32.gmra.mrb[10].mxu1 %vm222_vm0, %v3692_v54  ;;  %2999 = vmatmul.mubr.msk.f32.gmra.mrb[2].mxu0 %vm222_vm0, %v3548_v26 }
  0x95   : > { %2883 = vmatprep.mubr.msk.f32.mxu1 %vm222_vm0, %v3695_v55  ;;  %3001 = vmatprep.mubr.msk.f32.mxu0 %vm222_vm0, %v3554_v28 }
  0x98   : > { %2884 = vmatmul.mubr.msk.f32.gmra.mrb[12].mxu1 %vm222_vm0, %v3706_v56  ;;  %3002 = vmatmul.mubr.msk.f32.gmra.mrb[4].mxu0 %vm222_vm0, %v3568_v30 }
  0x99   : > { %2886 = vmatprep.mubr.msk.f32.mxu1 %vm222_vm0, %v3725_v59  ;;  %3004 = vmatprep.mubr.msk.f32.mxu0 %vm222_vm0, %v3572_v32 }
  0x9c   : > { %2887 = vmatmul.mubr.msk.f32.gmra.mrb[14].mxu1 %vm222_vm0, %v2537_v60  ;;  %3005 = vmatmul.mubr.msk.f32.gmra.mrb[6].mxu0 %vm222_vm0, %v3583_v34 }
  0x9d   : > { %2903 = vmatprep.mubr.msk.f32.mxu1 %vm222_vm0, %v3505_v18  ;;  %3007 = vmatprep.mubr.msk.f32.mxu0 %vm222_vm0, %v3589_v36 }
  0xa0   : > { %2904 = vmatmul.mubr.msk.f32.vlgmr.msra.gmra.mrb[8].mxu1 %vm222_vm0, %v3522_v21  ;;  %3008 = vmatmul.mubr.msk.f32.gmra.mrb[8].mxu0 %vm222_vm0, %v3604_v39 }
  0xa1   : > { %2906 = vmatprep.mubr.msk.f32.mxu1 %vm222_vm0, %v3530_v23  ;;  %3010 = vmatprep.mubr.msk.f32.mxu0 %vm222_vm0, %v3612_v41 }
  0xa4   : > { %2907 = vmatmul.mubr.msk.f32.gmra.mrb[10].mxu1 %vm222_vm0, %v3545_v25  ;;  %3011 = vmatmul.mubr.msk.f32.gmra.mrb[10].mxu0 %vm222_vm0, %v3626_v43 }
  0xa5   : > { %2909 = vmatprep.mubr.msk.f32.mxu1 %vm222_vm0, %v3551_v27  ;;  %3013 = vmatprep.mubr.msk.f32.mxu0 %vm222_vm0, %v3632_v45 }
  0xa8   : > { %2910 = vmatmul.mubr.msk.f32.gmra.mrb[12].mxu1 %vm222_vm0, %v3565_v29  ;;  %3014 = vmatmul.mubr.msk.f32.gmra.mrb[12].mxu0 %vm222_vm0, %v3646_v47 }
  0xa9   : > { %2912 = vmatprep.mubr.msk.f32.mxu1 %vm222_vm0, %v2569_v63  ;;  %3016 = vmatprep.mubr.msk.f32.mxu0 %vm222_vm0, %v2604_v3 }
  0xac   : > { %2913 = vmatmul.mubr.msk.f32.gmra.mrb[14].mxu1 %vm222_vm0, %v2570_v0  ;;  %3017 = vmatmul.mubr.msk.f32.gmra.mrb[14].mxu0 %vm222_vm0, %v2605_v4 }
 0x153   : > { %v2867_v5 = vpop.f32.mrb[0].mxu1 }
 0x154   : > { %v971_v6 = vpop.f32.mrb[1].mxu1 }
 0x157   : > { %v2870_v7 = vpop.f32.mrb[2].mxu1 }
 0x158   : > { %v981_v8 = vpop.f32.mrb[3].mxu1 }
 0x15b   : > { %v2873_v9 = vpop.f32.mrb[4].mxu1 }
 0x15c   : > { %v991_v10 = vpop.f32.mrb[5].mxu1 }
 0x15f   : > { %v2876_v11 = vpop.f32.mrb[6].mxu1 }
 0x160   : > { %v1001_v12 = vpop.f32.mrb[7].mxu1 }
 0x163   : > { %v2997_v13 = vpop.f32.mrb[0].mxu0 }
 0x164   : > { %v3021_v15 = vadd.f32 %v2997_v13, %v2867_v5  ;;  %v2109_v16 = vpop.f32.mrb[1].mxu0 }
 0x165   : > { %v3022_v17 = vadd.f32 %v2109_v16, %v971_v6 }
 0x166   : > { %v2212_v18 = vadd.f32 %v3021_v15, %v3878_v14 }
 0x167   : > { %v2211_v19 = vadd.f32 %v3022_v17, %v3878_v14  ;;  %v3000_v20 = vpop.f32.mrb[2].mxu0 }
 0x168   : > { %v2228_v21 = vmax.f32 %v2212_v18, 0.0  ;;  %v3023_v22 = vadd.f32 %v3000_v20, %v2870_v7  ;;  %v2119_v23 = vpop.f32.mrb[3].mxu0 }
 0x169   : > { %v2227_v24 = vmax.f32 %v2211_v19, 0.0  ;;  %v3024_v25 = vadd.f32 %v2119_v23, %v981_v8 }
 0x16a   : > { %2244 = vst [vmem:[%s3884_s5 + $0x8] sm:$0xff] %v2228_v21  ;;  %v2214_v26 = vadd.f32 %v3023_v22, %v3878_v14 }
 0x16b   : > { %2243 = vst [vmem:[%s3884_s5] sm:$0xff] %v2227_v24  ;;  %v2213_v27 = vadd.f32 %v3024_v25, %v3878_v14  ;;  %v3003_v28 = vpop.f32.mrb[4].mxu0 }
 0x16c   : > { %v2230_v29 = vmax.f32 %v2214_v26, 0.0  ;;  %v3025_v30 = vadd.f32 %v3003_v28, %v2873_v9  ;;  %v2129_v31 = vpop.f32.mrb[5].mxu0 }
 0x16d   : > { %v2229_v32 = vmax.f32 %v2213_v27, 0.0  ;;  %v3026_v33 = vadd.f32 %v2129_v31, %v991_v10 }
 0x16e   : > { %2246 = vst [vmem:[%s3884_s5 + $0x18] sm:$0xff] %v2230_v29  ;;  %v2216_v34 = vadd.f32 %v3025_v30, %v3878_v14 }
 0x16f   : > { %2245 = vst [vmem:[%s3884_s5 + $0x10] sm:$0xff] %v2229_v32  ;;  %v2215_v35 = vadd.f32 %v3026_v33, %v3878_v14  ;;  %v3006_v36 = vpop.f32.mrb[6].mxu0 }
 0x170   : > { %v2232_v37 = vmax.f32 %v2216_v34, 0.0  ;;  %v3027_v38 = vadd.f32 %v3006_v36, %v2876_v11  ;;  %v2139_v39 = vpop.f32.mrb[7].mxu0 }
 0x171   : > { %v2231_v40 = vmax.f32 %v2215_v35, 0.0  ;;  %v3028_v41 = vadd.f32 %v2139_v39, %v1001_v12 }
 0x172   : > { %2248 = vst [vmem:[%s3884_s5 + $0x28] sm:$0xff] %v2232_v37  ;;  %v2218_v42 = vadd.f32 %v3027_v38, %v3878_v14 }
 0x173   : > { %2247 = vst [vmem:[%s3884_s5 + $0x20] sm:$0xff] %v2231_v40  ;;  %v2217_v43 = vadd.f32 %v3028_v41, %v3878_v14  ;;  %v2905_v44 = vpop.f32.mrb[8].mxu1  ;;  %v3009_v45 = vpop.f32.mrb[8].mxu0 }
 0x174   : > { %v2234_v46 = vmax.f32 %v2218_v42, 0.0  ;;  %v3029_v47 = vadd.f32 %v3009_v45, %v2905_v44  ;;  %v1238_v48 = vpop.f32.mrb[9].mxu1  ;;  %v2149_v49 = vpop.f32.mrb[9].mxu0 }
 0x175   : > { %v2233_v50 = vmax.f32 %v2217_v43, 0.0  ;;  %v3030_v51 = vadd.f32 %v2149_v49, %v1238_v48 }
 0x176   : > { %2250 = vst [vmem:[%s3884_s5 + $0x38] sm:$0xff] %v2234_v46  ;;  %v2220_v52 = vadd.f32 %v3029_v47, %v3878_v14 }
 0x177   : > { %2249 = vst [vmem:[%s3884_s5 + $0x30] sm:$0xff] %v2233_v50  ;;  %v2219_v53 = vadd.f32 %v3030_v51, %v3878_v14  ;;  %v2908_v54 = vpop.f32.mrb[10].mxu1  ;;  %v3012_v55 = vpop.f32.mrb[10].mxu0 }
 0x178   : > { %v2236_v56 = vmax.f32 %v2220_v52, 0.0  ;;  %v3031_v57 = vadd.f32 %v3012_v55, %v2908_v54  ;;  %v1248_v58 = vpop.f32.mrb[11].mxu1  ;;  %v2159_v59 = vpop.f32.mrb[11].mxu0 }
 0x179   : > { %v2235_v60 = vmax.f32 %v2219_v53, 0.0  ;;  %v3032_v61 = vadd.f32 %v2159_v59, %v1248_v58 }
 0x17a   : > { %2252 = vst [vmem:[%s3884_s5 + $0x48] sm:$0xff] %v2236_v56  ;;  %v2222_v62 = vadd.f32 %v3031_v57, %v3878_v14 }
 0x17b   : > { %2251 = vst [vmem:[%s3884_s5 + $0x40] sm:$0xff] %v2235_v60  ;;  %v2221_v63 = vadd.f32 %v3032_v61, %v3878_v14  ;;  %v2911_v0 = vpop.f32.mrb[12].mxu1  ;;  %v3015_v1 = vpop.f32.mrb[12].mxu0 }
 0x17c   : > { %v2238_v2 = vmax.f32 %v2222_v62, 0.0  ;;  %v3033_v3 = vadd.f32 %v3015_v1, %v2911_v0  ;;  %v1258_v4 = vpop.f32.mrb[13].mxu1  ;;  %v2169_v5 = vpop.f32.mrb[13].mxu0 }
 0x17d   : > { %v2237_v6 = vmax.f32 %v2221_v63, 0.0  ;;  %v3034_v7 = vadd.f32 %v2169_v5, %v1258_v4 }
 0x17e   : > { %2254 = vst [vmem:[%s3884_s5 + $0x58] sm:$0xff] %v2238_v2  ;;  %v2224_v8 = vadd.f32 %v3033_v3, %v3878_v14 }
 0x17f   : > { %2253 = vst [vmem:[%s3884_s5 + $0x50] sm:$0xff] %v2237_v6  ;;  %v2223_v9 = vadd.f32 %v3034_v7, %v3878_v14  ;;  %v2914_v10 = vpop.f32.mrb[14].mxu1  ;;  %v3018_v11 = vpop.f32.mrb[14].mxu0 }
 0x180   : > { %v2240_v12 = vmax.f32 %v2224_v8, 0.0  ;;  %v3035_v13 = vadd.f32 %v3018_v11, %v2914_v10  ;;  %v1268_v15 = vpop.f32.mrb[15].mxu1  ;;  %v2179_v16 = vpop.f32.mrb[15].mxu0 }
 0x181   : > { %v2239_v17 = vmax.f32 %v2223_v9, 0.0  ;;  %v3036_v18 = vadd.f32 %v2179_v16, %v1268_v15 }
 0x182   : > { %2256 = vst [vmem:[%s3884_s5 + $0x68] sm:$0xff] %v2240_v12  ;;  %v2226_v19 = vadd.f32 %v3035_v13, %v3878_v14 }
 0x183   : > { %2255 = vst [vmem:[%s3884_s5 + $0x60] sm:$0xff] %v2239_v17  ;;  %v2225_v20 = vadd.f32 %v3036_v18, %v3878_v14 }
 0x184   : > { %v2242_v21 = vmax.f32 %v2226_v19, 0.0 }
 0x185   : > { %v2241_v22 = vmax.f32 %v2225_v20, 0.0 }
 0x186   : > { %2258 = vst [vmem:[%s3884_s5 + $0x78] sm:$0xff] %v2242_v21 }
 0x187   : > { %2257 = vst [vmem:[%s3884_s5 + $0x70] sm:$0xff] %v2241_v22 }
 0x188   : > { %3236 = shalt.err (!%p3233_p6)
}
 0x189   : > { %s3237_s27 = scalar_lea.hbm %s3920_s11, 2048  ;;  %s3241_s6 = scalar_lea.hbm %s3983_s3, 8192 }
 0x18a   : > { %p3238_p7 = scmp.ne.s32.totalorder %s3920_s11, %s3237_s27  ;;  %p3242_p11 = scmp.lt.u32.totalorder %s3920_s11, %s3983_s3 }
 0x18b   : > { %p3243_p12 = scmp.lt.u32.totalorder %s3241_s6, %s3237_s27  ;;  %p3245_p0 = scmp.lt.u32.totalorder %s3237_s27, %s3920_s11 }
 0x18c   : > { %p3239_p9 = pnand %p3238_p7, %p3393_p3 }
 0x18d   : > { %p3244_p13 = por %p3243_p12, %p3242_p11 }
 0x18e   : > { %p3240_p10 = pneg %p3239_p9 }
 0x18f   : > { %p3246_p1 = por %p3245_p0, %p3244_p13 }
 0x191   : > { %p3247_p2 = pnand %p3246_p1, %p3240_p10 }
 0x193   : > { %3250 = shalt.err (!%p3247_p2)
}
 0x194   : > { %s3320_s15 = smov 128   ;;  %s3321_s9 = smov 8  }
 0x195   : > { %3150 = dma.vmem_to_hbm [thread:$0]  (%p3393_p3), %s3922_s16, 2048, %s3920_s11, %s3928_s20, %s3320_s15, %s3320_s15, %s3321_s9  }
 0x196 PF: > { %p3156_p4 = scmp.ge.s32.totalorder %s3317_s19, 2  ;;  %s2291_s10 = sand.u32 1, %s3289_s12  }
 0x197   : > { %s2292_s21 = scalar_lea.sflag [#allocation3], %s2291_s10 }
 0x198   : > { %p3153_p5 = pnand %p3156_p4, %p3402_p8 }
 0x19a   : > { %3284 = dma.done.wait (!%p3153_p5), %s2292_s21, 2048  }
 0x19b   : > { %3286 = vsyncadd (!%p3153_p5), %s2292_s21, 4294965248  ;;  %s16_s19 = sadd.s32 1, %s3317_s19   ;;  %s3986_s12 = smov %s3293_s13 }
 0x19c   : > { %p13_p6 = scmp.ge.s32.totalorder %s16_s19, 6   ;;  %s3987_s13 = smov %s3297_s14 }
 0x19d   : > { %s3988_s14 = smov %s3411_s30  ;;  %s3989_s15 = smov %s3309_s17 }
 0x19e   : > { %s3990_s16 = smov %s3313_s18  ;;  %s3991_s17 = smov %s3994_s22 }
 0x19f   : > { %s3992_s18 = smov %s3998_s23  ;;  %15 = sbr.rel (!%p13_p6) target bundleno = 5 (0x5), region = 78 }
 0x1a6   :  { %2297 = vsyncpa [#allocation3], 1 }
 0x1a7   :  { %2299 = vsyncpa [#allocation3 + $0x1], 1 }

</bundles_post_ra>
